<compile_context>
chip_gen: v7x
topology: tpu7x:2x2x1
jax: 0.10.0
libtpu: 0.0.40
codegen_flags: <defaults>
</compile_context>

<pallas_src>
import jax
import jax.numpy as jnp
from jax.experimental import pallas as pl
from jax.experimental.pallas import tpu as pltpu

_LANE = 128
_SUBLANE = 8
_MAX_BLOCK_ROWS = 1024   # 1024*128*4B = 512 KiB per buffer -> safe on v5e/v6e/v7x


def _sigmoid_offset_kernel(off_ref, x_ref, o_ref):
    """o = 1 / (1 + exp(-(x - offset)));  offset is a (1,) f32 scalar in SMEM."""
    off = off_ref[0]
    z = x_ref[...].astype(jnp.float32) - off
    o_ref[...] = (1.0 / (1.0 + jnp.exp(-z))).astype(o_ref.dtype)


def sigmoid_with_offset(x, offset=0.0):
    """Pallas TPU implementation of MySigmoidWithOffset.forward."""
    orig_shape = x.shape
    orig_dtype = x.dtype

    flat = x.reshape(-1)
    n = flat.shape[0]

    # Lane-dense 2D slab: [rows, 128], rows a multiple of the sublane count (8)
    # and of the chosen row-tile so the grid divides evenly.
    rows_needed = pl.cdiv(n, _LANE)
    rows_needed = ((rows_needed + _SUBLANE - 1) // _SUBLANE) * _SUBLANE
    block_rows = min(_MAX_BLOCK_ROWS, rows_needed)
    rows = ((rows_needed + block_rows - 1) // block_rows) * block_rows
    padded = rows * _LANE

    if padded != n:
        flat = jnp.pad(flat, (0, padded - n))
    x2 = flat.reshape(rows, _LANE)

    off_arr = jnp.asarray(offset, dtype=jnp.float32).reshape(1)

    out2 = pl.pallas_call(
        _sigmoid_offset_kernel,
        out_shape=jax.ShapeDtypeStruct((rows, _LANE), orig_dtype),
        grid=(rows // block_rows,),
        in_specs=[
            pl.BlockSpec(memory_space=pltpu.MemorySpace.SMEM),     # offset scalar
            pl.BlockSpec((block_rows, _LANE), lambda i: (i, 0)),   # x row tile
        ],
        out_specs=pl.BlockSpec((block_rows, _LANE), lambda i: (i, 0)),
        compiler_params=pltpu.CompilerParams(
            dimension_semantics=("parallel",)),
    )(off_arr, x2)

    return out2.reshape(-1)[:n].reshape(orig_shape)


class MySigmoidWithOffsetPallas:
    """Drop-in equivalent of the PyTorch MySigmoidWithOffset module."""

    def __call__(self, x, offset=0):
        return sigmoid_with_offset(x, offset)


if __name__ == "__main__":
    key = jax.random.PRNGKey(0)
    x = jax.random.normal(key, (2, 4, 16, 16), jnp.float32)

    module = MySigmoidWithOffsetPallas()

    # offset = 0 (default) and a nonzero offset
    y0 = module(x)
    y1 = module(x, offset=0.5)
    jax.block_until_ready(y0)
    jax.block_until_ready(y1)

    # Correctness check against the plain-JAX reference of the spec formula.
    ref0 = 1.0 / (1.0 + jnp.exp(-(x - 0.0)))
    ref1 = 1.0 / (1.0 + jnp.exp(-(x - 0.5)))
    assert y0.shape == x.shape and y1.shape == x.shape
    assert bool(jnp.allclose(y0, ref0, atol=1e-6, rtol=1e-6))
    assert bool(jnp.allclose(y1, ref1, atol=1e-6, rtol=1e-6))

    print("KERNEL_OK")
</pallas_src>

<mosaic_0001>
module attributes {stable_mosaic.version = 11 : i64} {
  func.func @_sigmoid_offset_kernel(%arg0: i32, %arg1: memref<1xf32, #tpu.memory_space<smem>>, %arg2: memref<16x128xf32, #tpu.memory_space<vmem>>, %arg3: memref<16x128xf32, #tpu.memory_space<vmem>>) attributes {dimension_semantics = [#tpu.dimension_semantics<parallel>], iteration_bounds = array<i64: 1>, scalar_prefetch = 0 : i64, scratch_operands = 0 : i64, tpu.core_type = #tpu.core_type<tc>, window_params = [{transform_indices = @transform_0, window_bounds = array<i64: 1>}, {transform_indices = @transform_1, window_bounds = array<i64: 16, 128>}, {transform_indices = @transform_2, window_bounds = array<i64: 16, 128>}]} {
    %c0 = arith.constant 0 : index
    %0 = memref.load %arg1[%c0] : memref<1xf32, #tpu.memory_space<smem>>
    %c0_0 = arith.constant 0 : index
    %c0_1 = arith.constant 0 : index
    %1 = vector.load %arg2[%c0_0, %c0_1] : memref<16x128xf32, #tpu.memory_space<vmem>>, vector<16x128xf32>
    %2 = vector.broadcast %0 : f32 to vector<16x128xf32>
    %3 = arith.subf %1, %2 : vector<16x128xf32>
    %cst = arith.constant 0.000000e+00 : f32
    %4 = vector.broadcast %cst : f32 to vector<16x128xf32>
    %5 = arith.subf %4, %3 : vector<16x128xf32>
    %6 = math.exp %5 : vector<16x128xf32>
    %cst_2 = arith.constant 1.000000e+00 : f32
    %7 = vector.broadcast %cst_2 : f32 to vector<16x128xf32>
    %8 = arith.addf %7, %6 : vector<16x128xf32>
    %cst_3 = arith.constant 1.000000e+00 : f32
    %9 = vector.broadcast %cst_3 : f32 to vector<16x128xf32>
    %10 = arith.divf %9, %8 : vector<16x128xf32>
    %c0_4 = arith.constant 0 : index
    %c0_5 = arith.constant 0 : index
    %11 = vector.load %arg3[%c0_4, %c0_5] : memref<16x128xf32, #tpu.memory_space<vmem>>, vector<16x128xf32>
    tpu.vector_store %arg3[%c0_4, %c0_5], %10 {strides = array<i32>} : memref<16x128xf32, #tpu.memory_space<vmem>>, vector<16x128xf32>,
    return
  }
  func.func @transform_0(%arg0: i32) -> i32 {
    %c0_i32 = arith.constant 0 : i32
    %c0_i32_0 = arith.constant 0 : i32
    return %c0_i32 : i32
  }
  func.func @transform_1(%arg0: i32) -> (i32, i32) {
    %c0_i32 = arith.constant 0 : i32
    %c0_i32_0 = arith.constant 0 : i32
    return %arg0, %c0_i32 : i32, i32
  }
  func.func @transform_2(%arg0: i32) -> (i32, i32) {
    %c0_i32 = arith.constant 0 : i32
    %c0_i32_0 = arith.constant 0 : i32
    return %arg0, %c0_i32 : i32, i32
  }
}

</mosaic_0001>

<bundles_post_ra>
// kernel: tpu_custom_call.1
= control target key start
LH: loop header
LB: loop body
LE: loop exit
PB: predicated region body
PF: predicated region fallthrough
CT: control target
= control target key end

     0   :  { %8 = vsyncpa [#allocation4], 0  ;;  %s176_s0 = inlined_call_operand.<no memory space> [shape: f32[1], index: 0, kind: input, shape index: {}]   ;;  %s177_s1 = inlined_call_operand.hbm [shape: f32[16,128], index: 1, kind: input, shape index: {}]   ;;  %s178_s2 = inlined_call_operand.hbm [shape: f32[16,128], index: 2, kind: output, shape index: {}]  }
   0x1   :  { %9 = vsyncpa [#allocation5], 0  ;;  %s124_s9 = smov [#allocation3]   ;;  %s76_s13 = scalar_lea.hbm %s177_s1, 256 }
   0x2   :  { %s17_s10 = sshll.u32 %s124_s9, 4  ;;  %p77_p0 = scmp.ne.s32.totalorder %s177_s1, %s76_s13  ;;  %s18_s10 = int_to_ptr.vmem [resolvable:$true] %s17_s10 }
   0x3   :  { %p80_p1 = scmp.lt.u32.totalorder %s76_s13, %s177_s1 }
   0x5   :  { %p82_p2 = pnand %p80_p1, %p77_p0 }
   0x7   :  { %85 = shalt.err (!%p82_p2)
}
   0x8   :  { %s86_s18 = scalar_lea.vmem %s18_s10, 256  ;;  %p91_p4 = scmp.lt.s32.totalorder %s18_s10, %s18_s10 }
   0x9   :  { %p87_p3 = scmp.ne.s32.totalorder %s18_s10, %s86_s18  ;;  %p92_p5 = scmp.lt.s32.totalorder %s86_s18, %s86_s18 }
   0xb   :  { %p93_p6 = por %p92_p5, %p91_p4 }
   0xd   :  { %p94_p7 = pnand %p93_p6, %p87_p3 }
   0xf   :  { %97 = shalt.err (!%p94_p7)
}
  0x10   :  { %s125_s19 = smov 128   ;;  %s126_s20 = smov 8  }
  0x11   :  { %23 = dma.hbm_to_vmem [thread:$0]  %s177_s1, 256, %s18_s10, [#allocation4], %s125_s19, %s125_s19, %s126_s20  }
  0x12   :  { %120 = dma.done.wait [#allocation4], 256  }
  0x13   :  { %121 = vsyncadd [#allocation4], 4294967040  ;;  %v30_v0 = vstv %s176_s0  ;;  %v28_v1 = vld [vmem:[#allocation3] sm:$0xff]  ;;  %v29_v2 = vld [vmem:[#allocation3 + $0x8] sm:$0xff]  ;;  %s127_s1 = smov [#allocation6]  }
  0x14   :  { %v31_v3 = vsub.f32 %v28_v1, %v30_v0  ;;  %v32_v4 = vsub.f32 %v29_v2, %v30_v0  ;;  %s52_s25 = sshll.u32 %s127_s1, 4  ;;  %s53_s25 = int_to_ptr.vmem [resolvable:$true] %s52_s25 }
  0x15   :  { %s98_s0 = scalar_lea.vmem %s53_s25, 256  ;;  %p103_p9 = scmp.lt.s32.totalorder %s53_s25, %s53_s25 }
  0x16   :  { %v33_v5 = vsub.f32 0.0, %v31_v3  ;;  %v34_v6 = vsub.f32 0.0, %v32_v4  ;;  %p99_p8 = scmp.ne.s32.totalorder %s53_s25, %s98_s0  ;;  %p104_p10 = scmp.lt.s32.totalorder %s98_s0, %s98_s0 }
  0x18   :  { %v35_v7 = vmul.f32 1.442695, %v33_v5  ;;  %v37_v8 = vmul.f32 1.442695, %v34_v6  ;;  %p105_p11 = por %p104_p10, %p103_p9 }
  0x1a   :  { %68 = vpow2.f32 %v35_v7  ;;  %p106_p12 = pnand %p105_p11, %p99_p8 }
  0x1b   :  { %70 = vpow2.f32 %v37_v8 }
  0x24   :  { %v69_v9 = vpop.eup %68 }
  0x25   :  { %v71_v10 = vpop.eup %70  ;;  %v39_v11 = vadd.f32 1.0, %v69_v9 }
  0x26   :  { %v40_v12 = vadd.f32 1.0, %v71_v10 }
  0x27   :  { %72 = vrcp.f32 %v39_v11 }
  0x28   :  { %74 = vrcp.f32 %v40_v12 }
  0x31   :  { %v73_v13 = vpop.eup %72 }
  0x32   :  { %v75_v14 = vpop.eup %74  ;;  %45 = vst [vmem:[#allocation6] sm:$0xff] %v73_v13 }
  0x33   :  { %46 = vst [vmem:[#allocation6 + $0x8] sm:$0xff] %v75_v14 }
  0x34   :  { %109 = shalt.err (!%p106_p12)
}
  0x35   :  { %s110_s28 = scalar_lea.hbm %s178_s2, 256 }
  0x36   :  { %p111_p13 = scmp.ne.s32.totalorder %s178_s2, %s110_s28  ;;  %p114_p0 = scmp.lt.u32.totalorder %s110_s28, %s178_s2 }
  0x38   :  { %p116_p1 = pnand %p114_p0, %p111_p13 }
  0x3a   :  { %119 = shalt.err (!%p116_p1)
}
  0x3b   :  { %58 = dma.vmem_to_hbm [thread:$0]  %s53_s25, 256, %s178_s2, [#allocation5], %s125_s19, %s125_s19, %s126_s20  }
  0x3c   :  { %122 = dma.done.wait [#allocation5], 256  }
  0x3d   :  { %123 = vsyncadd [#allocation5], 4294967040 }
  0x3e   :  { %62 = vsyncpa [#allocation4], 1 }
  0x3f   :  { %63 = vsyncpa [#allocation5], 1 }

</bundles_post_ra>
